<compile_context>
chip_gen: v5e
topology: v5e:2x2
jax: 0.10.0
libtpu: 0.0.40
codegen_flags: <defaults>
</compile_context>

<pallas_src>
import functools

import jax
import jax.numpy as jnp
import numpy as np
from jax.experimental import pallas as pl
from jax.experimental.pallas import tpu as pltpu


# ----------------------------------------------------------------------------
# Pallas kernel: full forward pass for one batch tile (batch on the lane axis).
# ----------------------------------------------------------------------------
def _conv1d_regression_kernel(x_ref, w_ref, o_ref, *, out_size):
    # x_ref : (L, B_TILE)   input samples, transposed (length on sublanes)
    # w_ref : (R, 128)      packed weight slab (layout: see pack function)
    # o_ref : (out, B_TILE) lane-dense output block
    L = x_ref.shape[0]
    x = x_ref[...]                                   # (L, Bt) f32
    W = w_ref[...]                                   # (R, 128) f32

    # ---- unpack the weight slab (static slices of the resident tile) ------
    w1t = W[0:304, 0:L]                              # conv1 Toeplitz (304, L)
    b1r = W[0:304, 127:128]                          # conv1 bias per row (304, 1)
    w2t = W[304:336, 0:96]                           # conv2 Toeplitz (32, 96)
    b2r = W[304:336, 127:128]                        # conv2 bias per row (32, 1)
    wf1 = W[336:340, 0:8]                            # fc1 weight (4, 8)
    bf1 = W[336:340, 127:128]                        # fc1 bias   (4, 1)
    wf2 = W[340:340 + out_size, 0:4]                 # fc2 weight (out, 4)
    bf2 = W[340:340 + out_size, 127:128]             # fc2 bias   (out, 1)

    # ---- conv1 (1->16, k=3) + ReLU : ONE MXU matmul ------------------------
    # Row 16*p + c of h1 = conv1 output channel c at position p (p = 0..18).
    h1 = jnp.maximum(
        jnp.dot(w1t, x, preferred_element_type=jnp.float32) + b1r, 0.0
    )                                                # (304, Bt)

    # ---- MaxPool1d(4, stride=3) #1: sublane-aligned elementwise maxes ------
    # Window j covers conv1 positions 3j..3j+3 -> rows 48j .. 48j+64.
    pooled = []
    for j in range(6):
        base = 48 * j
        pooled.append(jnp.maximum(
            jnp.maximum(h1[base:base + 16], h1[base + 16:base + 32]),
            jnp.maximum(h1[base + 32:base + 48], h1[base + 48:base + 64])))
    p1 = jnp.concatenate(pooled, axis=0)             # (96, Bt), row 16j + c

    # ---- conv2 (16->8, k=3) + ReLU : Toeplitz MXU matmul -------------------
    # Row 8*m + o of h2 = conv2 output channel o at position m (m = 0..3).
    h2 = jnp.maximum(
        jnp.dot(w2t, p1, preferred_element_type=jnp.float32) + b2r, 0.0
    )                                                # (32, Bt)

    # ---- MaxPool1d(4, stride=3) #2: single window (L4 == 1) ----------------
    p2 = jnp.maximum(jnp.maximum(h2[0:8], h2[8:16]),
                     jnp.maximum(h2[16:24], h2[24:32]))   # (8, Bt)

    # ---- fc1 -> ReLU -> fc2 (batch stays on lanes, lane-dense store) -------
    f1 = jnp.maximum(
        jnp.dot(wf1, p2, preferred_element_type=jnp.float32) + bf1, 0.0
    )                                                # (4, Bt)
    o_ref[...] = jnp.dot(wf2, f1, preferred_element_type=jnp.float32) + bf2


# ----------------------------------------------------------------------------
# Weight packing: ONE (R, 128) f32 slab, including Toeplitz-expanded convs.
# Build this once per parameter set and reuse it across forward calls.
# ----------------------------------------------------------------------------
def pack_conv1d_regression_weights(params, input_size):
    L = int(input_size)
    L1 = L - 2
    L2 = (L1 - 4) // 3 + 1
    L3 = L2 - 2
    L4 = (L3 - 4) // 3 + 1
    assert L4 == 1, "Linear(8, 4) requires the second pooled length to be 1"

    f32 = jnp.float32
    out_size = params["wf2"].shape[0]

    w1 = params["w1"].astype(f32).reshape(16, 3)               # (16,1,3)->(16,3)
    b1 = params["b1"].astype(f32).reshape(16)
    w2 = params["w2"].astype(f32)                              # (8, 16, 3)
    b2 = params["b2"].astype(f32).reshape(8)
    wf1 = params["wf1"].astype(f32)                            # (4, 8)
    bf1 = params["bf1"].astype(f32).reshape(4)
    wf2 = params["wf2"].astype(f32)                            # (out, 4)
    bf2 = params["bf2"].astype(f32).reshape(out_size)

    # conv1 Toeplitz: W1_toe[16p + c, p + t] = w1[c, t], p = 0..18
    W1_toe = jnp.zeros((304, L), f32)
    for p in range(19):
        W1_toe = W1_toe.at[16 * p:16 * p + 16, p:p + 3].set(w1)
    b1_rows = jnp.tile(b1, 19)                                 # (304,)

    # conv2 Toeplitz: W2_toe[8m + o, 16(m+t) + c] = w2[o, c, t], m = 0..3
    w2_flat = jnp.transpose(w2, (0, 2, 1)).reshape(8, 48)      # col = 16t + c
    W2_toe = jnp.zeros((32, 96), f32)
    for m in range(4):
        W2_toe = W2_toe.at[8 * m:8 * m + 8, 16 * m:16 * m + 48].set(w2_flat)
    b2_rows = jnp.tile(b2, 4)                                  # (32,)

    R = ((340 + out_size + 7) // 8) * 8
    slab = jnp.zeros((R, 128), f32)
    slab = slab.at[0:304, 0:L].set(W1_toe)
    slab = slab.at[0:304, 127].set(b1_rows)
    slab = slab.at[304:336, 0:96].set(W2_toe)
    slab = slab.at[304:336, 127].set(b2_rows)
    slab = slab.at[336:340, 0:8].set(wf1)
    slab = slab.at[336:340, 127].set(bf1)
    slab = slab.at[340:340 + out_size, 0:4].set(wf2)
    slab = slab.at[340:340 + out_size, 127].set(bf2)
    return slab


# ----------------------------------------------------------------------------
# Wrapper: batch-tile selection, layout plumbing, pallas_call.
# ----------------------------------------------------------------------------
def conv1d_regression_forward(x, params, *, b_tile=1024, packed_slab=None):
    if x.ndim == 3:               # mirror torch: accept (B, 1, L) too
        x = x[:, 0, :]
    B, L = x.shape
    L1 = L - 2
    L2 = (L1 - 4) // 3 + 1
    L3 = L2 - 2
    L4 = (L3 - 4) // 3 + 1
    assert L4 == 1, "Linear(8, 4) requires the second pooled length to be 1"

    out_size = params["wf2"].shape[0]
    f32 = jnp.float32

    if packed_slab is None:
        packed_slab = pack_conv1d_regression_weights(params, L)
    R = packed_slab.shape[0]

    # --- batch tile: multiple of 128 lanes; keep >= 2 grid steps when there
    #     is enough work so v7x's 2 TensorCores both get tiles. -------------
    b128 = ((B + 127) // 128) * 128
    B_TILE = min(int(b_tile), b128)
    B_TILE = ((B_TILE + 127) // 128) * 128
    if b128 >= 256 and pl.cdiv(b128, B_TILE) < 2:
        B_TILE = ((b128 // 2 + 127) // 128) * 128
    n_tiles = pl.cdiv(B, B_TILE)
    B_pad = n_tiles * B_TILE

    # Input transposed to (L, B_pad): length on sublanes, batch on lanes
    # (contiguous 4*B_TILE-byte DMA rows). Pad the batch tail only if needed.
    # TODO(synk): fusing this transpose into the producer would save one HBM
    # pass over the input; kept here because it keeps DMA rows contiguous.
    xT = x.astype(f32).T                                       # (L, B)
    if B_pad != B:
        xT = jnp.pad(xT, ((0, 0), (0, B_pad - B)))

    out = pl.pallas_call(
        functools.partial(_conv1d_regression_kernel, out_size=out_size),
        out_shape=jax.ShapeDtypeStruct((out_size, B_pad), f32),
        grid=(n_tiles,),
        in_specs=[
            pl.BlockSpec((L, B_TILE), lambda b: (0, b)),       # one batch tile / step
            pl.BlockSpec((R, 128), lambda b: (0, 0)),          # weight slab, resident
        ],
        out_specs=pl.BlockSpec((out_size, B_TILE), lambda b: (0, b)),  # lane-dense
        compiler_params=pltpu.CompilerParams(
            dimension_semantics=("parallel",)),                # batch tiles independent
    )(xT, packed_slab)

    return out[:, :B].T                                        # (B, out_size)


# ----------------------------------------------------------------------------
# Pure-JAX reference (independent formulation) for a correctness check.
# ----------------------------------------------------------------------------
def reference_forward(x, params):
    B, L = x.shape
    xc = x[:, None, :]                                                # (B, 1, L)
    L1 = L - 2
    h1 = sum(jnp.einsum("oc,bcl->bol", params["w1"][:, :, t], xc[:, :, t:t + L1])
             for t in range(3)) + params["b1"][None, :, None]
    h1 = jnp.maximum(h1, 0.0)
    L2 = (L1 - 4) // 3 + 1
    p1 = jnp.stack([jnp.max(h1[:, :, 3 * i:3 * i + 4], axis=-1) for i in range(L2)], axis=-1)
    L3 = L2 - 2
    h2 = sum(jnp.einsum("oc,bcl->bol", params["w2"][:, :, t], p1[:, :, t:t + L3])
             for t in range(3)) + params["b2"][None, :, None]
    h2 = jnp.maximum(h2, 0.0)
    L4 = (L3 - 4) // 3 + 1
    p2 = jnp.stack([jnp.max(h2[:, :, 3 * i:3 * i + 4], axis=-1) for i in range(L4)], axis=-1)
    f = p2.reshape(B, -1)                                             # (B, 8)
    f1 = jnp.maximum(f @ params["wf1"].T + params["bf1"], 0.0)
    return f1 @ params["wf2"].T + params["bf2"]


if __name__ == "__main__":
    input_size = 23          # -> conv/pool chain gives flattened feature size 8
    output_size = 2
    batch = 300              # not a multiple of 128: exercises padding + a 2-step grid

    key = jax.random.PRNGKey(0)
    ks = jax.random.split(key, 9)
    params = {
        "w1":  jax.random.normal(ks[0], (16, 1, 3), jnp.float32) * 0.3,
        "b1":  jax.random.normal(ks[1], (16,), jnp.float32) * 0.1,
        "w2":  jax.random.normal(ks[2], (8, 16, 3), jnp.float32) * 0.15,
        "b2":  jax.random.normal(ks[3], (8,), jnp.float32) * 0.1,
        "wf1": jax.random.normal(ks[4], (4, 8), jnp.float32) * 0.3,
        "bf1": jax.random.normal(ks[5], (4,), jnp.float32) * 0.1,
        "wf2": jax.random.normal(ks[6], (output_size, 4), jnp.float32) * 0.3,
        "bf2": jax.random.normal(ks[7], (output_size,), jnp.float32) * 0.1,
    }
    x = jax.random.normal(ks[8], (batch, input_size), jnp.float32)

    # Pack the weight slab ONCE (cacheable per parameter set) and reuse it.
    slab = jax.block_until_ready(pack_conv1d_regression_weights(params, input_size))

    y = jax.block_until_ready(
        conv1d_regression_forward(x, params, packed_slab=slab))
    assert y.shape == (batch, output_size)

    y_ref = jax.block_until_ready(reference_forward(x, params))
    np.testing.assert_allclose(np.asarray(y), np.asarray(y_ref), rtol=1e-4, atol=1e-4)

    print("KERNEL_OK")
</pallas_src>

<mosaic_0001>
module attributes {stable_mosaic.version = 11 : i64} {
  func.func @_conv1d_regression_kernel(%arg0: i32, %arg1: memref<23x256xf32, #tpu.memory_space<vmem>>, %arg2: memref<344x128xf32, #tpu.memory_space<vmem>>, %arg3: memref<2x256xf32, #tpu.memory_space<vmem>>) attributes {dimension_semantics = [#tpu.dimension_semantics<parallel>], iteration_bounds = array<i64: 2>, scalar_prefetch = 0 : i64, scratch_operands = 0 : i64, tpu.core_type = #tpu.core_type<tc>, window_params = [{transform_indices = @transform_0, window_bounds = array<i64: 23, 256>}, {pipeline_mode = #tpu.pipeline_mode<synchronous>, transform_indices = @transform_1, window_bounds = array<i64: 344, 128>}, {transform_indices = @transform_2, window_bounds = array<i64: 2, 256>}]} {
    %c0 = arith.constant 0 : index
    %c0_0 = arith.constant 0 : index
    %0 = vector.load %arg1[%c0, %c0_0] : memref<23x256xf32, #tpu.memory_space<vmem>>, vector<23x256xf32>
    %c0_1 = arith.constant 0 : index
    %c0_2 = arith.constant 0 : index
    %1 = vector.load %arg2[%c0_1, %c0_2] : memref<344x128xf32, #tpu.memory_space<vmem>>, vector<344x128xf32>
    %2 = vector.extract_strided_slice %1 {offsets = [0, 0], sizes = [304, 23], strides = [1, 1]} : vector<344x128xf32> to vector<304x23xf32>
    %3 = vector.extract_strided_slice %1 {offsets = [0, 127], sizes = [304, 1], strides = [1, 1]} : vector<344x128xf32> to vector<304x1xf32>
    %4 = vector.extract_strided_slice %1 {offsets = [304, 0], sizes = [32, 96], strides = [1, 1]} : vector<344x128xf32> to vector<32x96xf32>
    %5 = vector.extract_strided_slice %1 {offsets = [304, 127], sizes = [32, 1], strides = [1, 1]} : vector<344x128xf32> to vector<32x1xf32>
    %6 = vector.extract_strided_slice %1 {offsets = [336, 0], sizes = [4, 8], strides = [1, 1]} : vector<344x128xf32> to vector<4x8xf32>
    %7 = vector.extract_strided_slice %1 {offsets = [336, 127], sizes = [4, 1], strides = [1, 1]} : vector<344x128xf32> to vector<4x1xf32>
    %8 = vector.extract_strided_slice %1 {offsets = [340, 0], sizes = [2, 4], strides = [1, 1]} : vector<344x128xf32> to vector<2x4xf32>
    %9 = vector.extract_strided_slice %1 {offsets = [340, 127], sizes = [2, 1], strides = [1, 1]} : vector<344x128xf32> to vector<2x1xf32>
    %cst = arith.constant dense<0.000000e+00> : vector<304x256xf32>
    %10 = tpu.matmul %2, %0, %cst {dimension_numbers = #tpu.dot_dimension_numbers<[1], [0], [0], [1], [0, 0, 1, 1], [], []>} : vector<304x23xf32>, vector<23x256xf32>, vector<304x256xf32> -> vector<304x256xf32>
    %11 = vector.broadcast %3 : vector<304x1xf32> to vector<304x256xf32>
    %12 = arith.addf %10, %11 : vector<304x256xf32>
    %cst_3 = arith.constant 0.000000e+00 : f32
    %13 = vector.broadcast %cst_3 : f32 to vector<304x256xf32>
    %14 = arith.maximumf %12, %13 : vector<304x256xf32>
    %15 = vector.extract_strided_slice %14 {offsets = [0, 0], sizes = [16, 256], strides = [1, 1]} : vector<304x256xf32> to vector<16x256xf32>
    %16 = vector.extract_strided_slice %14 {offsets = [16, 0], sizes = [16, 256], strides = [1, 1]} : vector<304x256xf32> to vector<16x256xf32>
    %17 = arith.maximumf %15, %16 : vector<16x256xf32>
    %18 = vector.extract_strided_slice %14 {offsets = [32, 0], sizes = [16, 256], strides = [1, 1]} : vector<304x256xf32> to vector<16x256xf32>
    %19 = vector.extract_strided_slice %14 {offsets = [48, 0], sizes = [16, 256], strides = [1, 1]} : vector<304x256xf32> to vector<16x256xf32>
    %20 = arith.maximumf %18, %19 : vector<16x256xf32>
    %21 = arith.maximumf %17, %20 : vector<16x256xf32>
    %22 = vector.extract_strided_slice %14 {offsets = [48, 0], sizes = [16, 256], strides = [1, 1]} : vector<304x256xf32> to vector<16x256xf32>
    %23 = vector.extract_strided_slice %14 {offsets = [64, 0], sizes = [16, 256], strides = [1, 1]} : vector<304x256xf32> to vector<16x256xf32>
    %24 = arith.maximumf %22, %23 : vector<16x256xf32>
    %25 = vector.extract_strided_slice %14 {offsets = [80, 0], sizes = [16, 256], strides = [1, 1]} : vector<304x256xf32> to vector<16x256xf32>
    %26 = vector.extract_strided_slice %14 {offsets = [96, 0], sizes = [16, 256], strides = [1, 1]} : vector<304x256xf32> to vector<16x256xf32>
    %27 = arith.maximumf %25, %26 : vector<16x256xf32>
    %28 = arith.maximumf %24, %27 : vector<16x256xf32>
    %29 = vector.extract_strided_slice %14 {offsets = [96, 0], sizes = [16, 256], strides = [1, 1]} : vector<304x256xf32> to vector<16x256xf32>
    %30 = vector.extract_strided_slice %14 {offsets = [112, 0], sizes = [16, 256], strides = [1, 1]} : vector<304x256xf32> to vector<16x256xf32>
    %31 = arith.maximumf %29, %30 : vector<16x256xf32>
    %32 = vector.extract_strided_slice %14 {offsets = [128, 0], sizes = [16, 256], strides = [1, 1]} : vector<304x256xf32> to vector<16x256xf32>
    %33 = vector.extract_strided_slice %14 {offsets = [144, 0], sizes = [16, 256], strides = [1, 1]} : vector<304x256xf32> to vector<16x256xf32>
    %34 = arith.maximumf %32, %33 : vector<16x256xf32>
    %35 = arith.maximumf %31, %34 : vector<16x256xf32>
    %36 = vector.extract_strided_slice %14 {offsets = [144, 0], sizes = [16, 256], strides = [1, 1]} : vector<304x256xf32> to vector<16x256xf32>
    %37 = vector.extract_strided_slice %14 {offsets = [160, 0], sizes = [16, 256], strides = [1, 1]} : vector<304x256xf32> to vector<16x256xf32>
    %38 = arith.maximumf %36, %37 : vector<16x256xf32>
    %39 = vector.extract_strided_slice %14 {offsets = [176, 0], sizes = [16, 256], strides = [1, 1]} : vector<304x256xf32> to vector<16x256xf32>
    %40 = vector.extract_strided_slice %14 {offsets = [192, 0], sizes = [16, 256], strides = [1, 1]} : vector<304x256xf32> to vector<16x256xf32>
    %41 = arith.maximumf %39, %40 : vector<16x256xf32>
    %42 = arith.maximumf %38, %41 : vector<16x256xf32>
    %43 = vector.extract_strided_slice %14 {offsets = [192, 0], sizes = [16, 256], strides = [1, 1]} : vector<304x256xf32> to vector<16x256xf32>
    %44 = vector.extract_strided_slice %14 {offsets = [208, 0], sizes = [16, 256], strides = [1, 1]} : vector<304x256xf32> to vector<16x256xf32>
    %45 = arith.maximumf %43, %44 : vector<16x256xf32>
    %46 = vector.extract_strided_slice %14 {offsets = [224, 0], sizes = [16, 256], strides = [1, 1]} : vector<304x256xf32> to vector<16x256xf32>
    %47 = vector.extract_strided_slice %14 {offsets = [240, 0], sizes = [16, 256], strides = [1, 1]} : vector<304x256xf32> to vector<16x256xf32>
    %48 = arith.maximumf %46, %47 : vector<16x256xf32>
    %49 = arith.maximumf %45, %48 : vector<16x256xf32>
    %50 = vector.extract_strided_slice %14 {offsets = [240, 0], sizes = [16, 256], strides = [1, 1]} : vector<304x256xf32> to vector<16x256xf32>
    %51 = vector.extract_strided_slice %14 {offsets = [256, 0], sizes = [16, 256], strides = [1, 1]} : vector<304x256xf32> to vector<16x256xf32>
    %52 = arith.maximumf %50, %51 : vector<16x256xf32>
    %53 = vector.extract_strided_slice %14 {offsets = [272, 0], sizes = [16, 256], strides = [1, 1]} : vector<304x256xf32> to vector<16x256xf32>
    %54 = vector.extract_strided_slice %14 {offsets = [288, 0], sizes = [16, 256], strides = [1, 1]} : vector<304x256xf32> to vector<16x256xf32>
    %55 = arith.maximumf %53, %54 : vector<16x256xf32>
    %56 = arith.maximumf %52, %55 : vector<16x256xf32>
    %57 = tpu.concatenate %21, %28, %35, %42, %49, %56 in 0 : vector<16x256xf32>, vector<16x256xf32>, vector<16x256xf32>, vector<16x256xf32>, vector<16x256xf32>, vector<16x256xf32> -> vector<96x256xf32>
    %cst_4 = arith.constant dense<0.000000e+00> : vector<32x256xf32>
    %58 = tpu.matmul %4, %57, %cst_4 {dimension_numbers = #tpu.dot_dimension_numbers<[1], [0], [0], [1], [0, 0, 1, 1], [], []>} : vector<32x96xf32>, vector<96x256xf32>, vector<32x256xf32> -> vector<32x256xf32>
    %59 = vector.broadcast %5 : vector<32x1xf32> to vector<32x256xf32>
    %60 = arith.addf %58, %59 : vector<32x256xf32>
    %cst_5 = arith.constant 0.000000e+00 : f32
    %61 = vector.broadcast %cst_5 : f32 to vector<32x256xf32>
    %62 = arith.maximumf %60, %61 : vector<32x256xf32>
    %63 = vector.extract_strided_slice %62 {offsets = [0, 0], sizes = [8, 256], strides = [1, 1]} : vector<32x256xf32> to vector<8x256xf32>
    %64 = vector.extract_strided_slice %62 {offsets = [8, 0], sizes = [8, 256], strides = [1, 1]} : vector<32x256xf32> to vector<8x256xf32>
    %65 = arith.maximumf %63, %64 : vector<8x256xf32>
    %66 = vector.extract_strided_slice %62 {offsets = [16, 0], sizes = [8, 256], strides = [1, 1]} : vector<32x256xf32> to vector<8x256xf32>
    %67 = vector.extract_strided_slice %62 {offsets = [24, 0], sizes = [8, 256], strides = [1, 1]} : vector<32x256xf32> to vector<8x256xf32>
    %68 = arith.maximumf %66, %67 : vector<8x256xf32>
    %69 = arith.maximumf %65, %68 : vector<8x256xf32>
    %cst_6 = arith.constant dense<0.000000e+00> : vector<4x256xf32>
    %70 = tpu.matmul %6, %69, %cst_6 {dimension_numbers = #tpu.dot_dimension_numbers<[1], [0], [0], [1], [0, 0, 1, 1], [], []>} : vector<4x8xf32>, vector<8x256xf32>, vector<4x256xf32> -> vector<4x256xf32>
    %71 = vector.broadcast %7 : vector<4x1xf32> to vector<4x256xf32>
    %72 = arith.addf %70, %71 : vector<4x256xf32>
    %cst_7 = arith.constant 0.000000e+00 : f32
    %73 = vector.broadcast %cst_7 : f32 to vector<4x256xf32>
    %74 = arith.maximumf %72, %73 : vector<4x256xf32>
    %cst_8 = arith.constant dense<0.000000e+00> : vector<2x256xf32>
    %75 = tpu.matmul %8, %74, %cst_8 {dimension_numbers = #tpu.dot_dimension_numbers<[1], [0], [0], [1], [0, 0, 1, 1], [], []>} : vector<2x4xf32>, vector<4x256xf32>, vector<2x256xf32> -> vector<2x256xf32>
    %76 = vector.broadcast %9 : vector<2x1xf32> to vector<2x256xf32>
    %77 = arith.addf %75, %76 : vector<2x256xf32>
    %c0_9 = arith.constant 0 : index
    %c0_10 = arith.constant 0 : index
    %78 = vector.load %arg3[%c0_9, %c0_10] : memref<2x256xf32, #tpu.memory_space<vmem>>, vector<2x256xf32>
    tpu.vector_store %arg3[%c0_9, %c0_10], %77 {strides = array<i32>} : memref<2x256xf32, #tpu.memory_space<vmem>>, vector<2x256xf32>,
    return
  }
  func.func @transform_0(%arg0: i32) -> (i32, i32) {
    %c0_i32 = arith.constant 0 : i32
    %c0_i32_0 = arith.constant 0 : i32
    return %c0_i32, %arg0 : i32, i32
  }
  func.func @transform_1(%arg0: i32) -> (i32, i32) {
    %c0_i32 = arith.constant 0 : i32
    %c0_i32_0 = arith.constant 0 : i32
    %c0_i32_1 = arith.constant 0 : i32
    return %c0_i32, %c0_i32_0 : i32, i32
  }
  func.func @transform_2(%arg0: i32) -> (i32, i32) {
    %c0_i32 = arith.constant 0 : i32
    %c0_i32_0 = arith.constant 0 : i32
    return %c0_i32, %arg0 : i32, i32
  }
}

</mosaic_0001>

<bundles_post_ra>
// kernel: tpu_custom_call.1
= control target key start
LH: loop header
LB: loop body
LE: loop exit
PB: predicated region body
PF: predicated region fallthrough
CT: control target
= control target key end

     0   :  { %7 = vsyncpa [#allocation3], 0  ;;  %s2254_s0 = inlined_call_operand.hbm [shape: f32[23,512], index: 0, kind: input, shape index: {}]   ;;  %s2255_s1 = inlined_call_operand.hbm [shape: f32[344,128], index: 1, kind: input, shape index: {}]   ;;  %s2256_s2 = inlined_call_operand.hbm [shape: f32[2,512], index: 2, kind: output, shape index: {}]  }
   0x1   :  { %9 = vsyncpa [#allocation3 + $0x1], 0 }
   0x2   :  { %10 = vsyncpa [#allocation6], 0 }
   0x3   :  { %11 = vsyncpa [#allocation4], 0 }
   0x4   :  { %13 = vsyncpa [#allocation4 + $0x1], 0  ;;  %s1560_s9 = smov 0   ;;  %s1562_s10 = smov 0  }
   0x5   :  { %s1564_s11 = smov 0   ;;  %s1566_s12 = smov 0  }
   0x6 LB: > { %s1581_s13 = sadd.s32 4294967295, %s1536_s12   ;;  %s1224_s14 = sadd.s32 4294967294, %s1536_s12   ;;  %s1536_s12 = sphi %s1566_s12, %s2357_s12   ;;  %s1532_s11 = sphi %s1564_s11, %s2356_s11   ;;  %s1528_s10 = sphi %s1562_s10, %s2355_s10   ;;  %s1524_s9 = sphi %s1560_s9, %s2354_s9  }
   0x7   : > { %p39_p0 = scmp.ne.s32.totalorder %s1528_s10, %s1524_s9  ;;  %p40_p1 = scmp.eq.s32.totalorder %s1581_s13, 0 }
   0x8   : > { %p84_p2 = scmp.eq.s32.totalorder %s1581_s13, 1  ;;  %p90_p3 = scmp.eq.s32.totalorder %s1224_s14, 1 }
   0x9   : > { %p1590_p4 = por %p40_p1, %p39_p0  ;;  %p1225_p5 = scmp.ge.s32.totalorder %s1536_s12, 1 }
   0xa   : > { %p1595_p6 = por %p90_p3, %p39_p0  ;;  %p97_p7 = scmp.lt.s32.totalorder %s1536_s12, 3 }
   0xb   : > { %s108_s19 = sshll.u32 %s2255_s1, 4  ;;  %s1538_s21 = smov [#allocation5]   ;;  %s109_s19 = int_to_ptr.hbm [resolvable:$true] %s108_s19 }
   0xc   : > { %p1603_p8 = pnand %p1225_p5, %p97_p7  ;;  %s110_s22 = sshll.u32 %s1538_s21, 4  ;;  %s111_s22 = int_to_ptr.vmem [resolvable:$true] %s110_s22 }
   0xd   : > { %s1613_s23 = sadd.s32 1, %s1536_s12   ;;  %s1539_s24 = smov 128  }
   0xe   : > { %p1348_p9 = pneg %p1603_p8  ;;  %s1540_s25 = smov 8  }
   0xf   : > { %s23_s26 = ssub.s32 %s1536_s12, %s1613_s23  ;;  %s26_s27 = sadd.s32 1, %s1532_s11 }
  0x10   : > { %p1349_p10 = pnand %p1348_p9, %p40_p1  ;;  %p24_p12 = scmp.eq.s32.totalorder %s23_s26, 0 }
  0x11   : > { %p33_p13 = scmp.ne.s32.totalorder %s1532_s11, %s1528_s10  ;;  %p34_p0 = scmp.eq.s32.totalorder %s1536_s12, 0 }
  0x12   : > { %1351 = dma.hbm_to_vmem [thread:$0]  (!%p1349_p10), %s109_s19, 5504, %s111_s22, [#allocation6], %s1539_s24, %s1539_s24, %s1540_s25  }
  0x13   : > { %p1361_p3 = scmp.lt.s32.totalorder %s1536_s12, 2  ;;  %p35_p5 = por %p34_p0, %p33_p13 }
  0x14   : > { %s1623_s28 = scalar_select %p24_p12, %s1532_s11, %s26_s27  }
  0x15   : > { %p1627_p7 = por %p84_p2, %p33_p13  ;;  %s124_s30 = sand.u32 1, %s1532_s11  }
  0x16   : > { %s1330_s3 = sshll.u32 %s1536_s12, 4  ;;  %s1338_s4 = smul.u32 48, %s124_s30 }
  0x17   : > { %s133_s7 = scalar_lea.hbm %s2254_s0, %s1330_s3  ;;  %p1636_p9 = pnand %p1361_p3, %p35_p5 }
  0x18   : > { %s134_s14 = sshll.u32 %s133_s7, 4  ;;  %s128_s17 = scalar_lea.vmem [#allocation2], %s1338_s4  ;;  %s135_s14 = int_to_ptr.hbm [resolvable:$true] %s134_s14 }
  0x19   : > { %s136_s18 = sshll.u32 %s128_s17, 4  ;;  %s125_s19 = scalar_lea.sflag [#allocation3], %s124_s30  ;;  %s137_s18 = int_to_ptr.vmem [resolvable:$true] %s136_s18 }
  0x1a   : > { %s1436_s21 = sshra.s32 %s135_s14, 4  ;;  %p1440_p10 = pneg %p1636_p9  ;;  %s1437_s21 = int_to_ptr.hbm [resolvable:$true] %s1436_s21 }
  0x1b   : > { %s1438_s22 = scalar_lea.hbm %s1437_s21, 48  ;;  %s1443_s26 = scalar_lea.hbm %s2254_s0, 96 }
  0x1c   : > { %p1439_p2 = scmp.ne.s32.totalorder %s1437_s21, %s1438_s22  ;;  %p1444_p0 = scmp.lt.s32.totalorder %s1437_s21, %s2254_s0 }
  0x1d   : > { %p1445_p3 = scmp.lt.s32.totalorder %s1443_s26, %s1438_s22 }
  0x1e   : > { %p1441_p12 = pnand %p1440_p10, %p1439_p2 }
  0x1f   : > { %p1446_p5 = por %p1445_p3, %p1444_p0 }
  0x20   : > { %p1442_p13 = pneg %p1441_p12 }
  0x22   : > { %p1447_p11 = pnand %p1446_p5, %p1442_p13 }
  0x24   : > { %1450 = shalt.err (!%p1447_p11)
}
  0x25   : > { %s1541_s30 = smov 512   ;;  %s1542_s4 = smov 256  }
  0x26   : > { %s1543_s5 = smov 16   ;;  %148 = sbr.rel (%p1603_p8) target bundleno = 823 (0x337), region = 28 }
  0x27   : > { %1355 = dma.hbm_to_vmem [thread:$0]  (!%p1636_p9), %s135_s14, 768, %s137_s18, %s125_s19, %s1541_s30, %s1542_s4, %s1543_s5  }
  0x2b   : > { %s1653_s6 = sand.u32 1, %s1528_s10  }
  0x2c   : > { %s1339_s7 = smul.u32 48, %s1653_s6  ;;  %s151_s17 = scalar_lea.sflag [#allocation3], %s1653_s6 }
  0x2e   : > { %s154_s21 = scalar_lea.vmem [#allocation2], %s1339_s7 }
  0x2f   : > { %1511 = dma.done.wait (%p1590_p4), %s151_s17, 768  }
  0x30   : > { %1513 = vsyncadd (%p1590_p4), %s151_s17, 4294966528 }
  0x31   : > { %1515 = dma.done.wait (%p40_p1), [#allocation6], 5504  }
  0x32   : > { %1517 = vsyncadd (%p40_p1), [#allocation6], 4294961792  ;;  %v1544_v0 = vmov 127   ;;  %vm499_vm0 = vcmask 1046528   ;;  %v1665_v1 = vld [vmem:[#allocation5 + $0x118] sm:$0xff]  ;;  %v1669_v3 = vld [vmem:[#allocation5 + $0xf0] sm:$0xff] }
  0x33   : > { %1405 = vset.pattern.permute.xlu2 %v1544_v0  ;;  %1404 = vset.pattern.permute.xlu1 %v1544_v0  ;;  %v1667_v2 = vld [vmem:[#allocation5 + $0xf8] sm:$0xff]  ;;  %v187_v4 = vld [vmem:[%s154_s21 + $0x20] sm:$0x7f]  ;;  %v185_v6 = vld [vmem:[%s154_s21 + $0x10] sm:$0xff]  ;;  %vm422_vm1 = vcmask 187392   ;;  %vm936_vm2 = vcmask 785408  }
  0x34   : > { %1403 = vset.pattern.permute.xlu0 %v1544_v0  ;;  %409 = vperm.xlu1 %1404, %v1665_v1   ;;  %v188_v5 = vld [vmem:[%s154_s21 + $0x28] sm:$0x7f]  ;;  %v186_v7 = vld [vmem:[%s154_s21 + $0x18] sm:$0xff]  ;;  %v183_v8 = vld [vmem:[%s154_s21] sm:$0xff]  ;;  %vm1022_vm3 = vcmask 64512   ;;  %vm1073_vm4 = vcmask 1043456  }
  0x35   : > { %389 = vperm.xlu0 %1403, %v1667_v2   ;;  %384 = vperm.xlu2 %1405, %v1669_v3   ;;  %v184_v9 = vld [vmem:[%s154_s21 + $0x8] sm:$0xff]  ;;  %v1674_v10 = vld [vmem:[#allocation5] sm:$0xff]  ;;  %v1676_v12 = vld [vmem:[#allocation5 + $0xb0] sm:$0xff]  ;;  %vm1070_vm5 = vcmask 31744   ;;  %s1232_s15 = sshll.u32 %s1653_s6, 2  ;;  %s1331_s20 = sshll.u32 %s1581_s13, 2 }
  0x36   : > { %1233 = vmatpush.msk.msra.mxu0 %vm499_vm0, %v187_v4  ;;  %1332 = vmatpush.msk.msra.mxu2 %vm499_vm0, %v187_v4  ;;  %v212_v11 = vld [vmem:[#allocation5 + $0xb8] sm:$0xff]  ;;  %v1678_v13 = vld [vmem:[#allocation5 + $0x128] sm:$0xff]  ;;  %v1684_v15 = vld [vmem:[#allocation5 + $0x100] sm:$0xff]  ;;  %s1139_s18 = scalar_lea.hbm %s2256_s2, %s1331_s20  ;;  %s180_s19 = scalar_lea.vmem [#allocation7], %s1232_s15  ;;  %vm1123_vm6 = vcmask 1041408  }
  0x37   : > { %1272 = vmatpush.msk.msra.mxu1 %vm499_vm0, %v188_v5  ;;  %1335 = vmatpush.msk.msra.mxu3 %vm499_vm0, %v188_v5  ;;  %v1682_v14 = vld [vmem:[#allocation5 + $0x108] sm:$0xff]  ;;  %v213_v17 = vld [vmem:[#allocation5 + $0xc0] sm:$0xff]  ;;  %v1700_v19 = vld [vmem:[#allocation5 + $0x110] sm:$0xff]  ;;  %s1141_s22 = sshll.u32 %s180_s19, 4  ;;  %s1143_s24 = sshll.u32 %s1139_s18, 4  ;;  %s1142_s22 = int_to_ptr.vmem [resolvable:$true] %s1141_s22  ;;  %s1144_s24 = int_to_ptr.hbm [resolvable:$true] %s1143_s24 }
  0x38   : > { %520 = vmatpush.msra.mxu0 %v185_v6  ;;  %1333 = vmatpush.msra.mxu2 %v185_v6  ;;  %v1694_v16 = vld [vmem:[#allocation5 + $0x8] sm:$0xff]  ;;  %v1696_v18 = vld [vmem:[#allocation5 + $0x120] sm:$0xff]  ;;  %v1708_v21 = vld [vmem:[#allocation5 + $0x10] sm:$0xff]  ;;  %s1128_s13 = scalar_lea.sflag [#allocation4], %s1653_s6  ;;  %s1480_s25 = sshra.s32 %s1144_s24, 4  ;;  %s1481_s25 = int_to_ptr.hbm [resolvable:$true] %s1480_s25 }
  0x39   : > { %651 = vmatpush.msra.mxu1 %v186_v7  ;;  %1336 = vmatpush.msra.mxu3 %v186_v7  ;;  %v214_v20 = vld [vmem:[#allocation5 + $0xc8] sm:$0xff]  ;;  %v216_v23 = vld [vmem:[#allocation5 + $0xd8] sm:$0xff]  ;;  %v215_v25 = vld [vmem:[#allocation5 + $0xd0] sm:$0xff]  ;;  %s1482_s26 = scalar_lea.hbm %s1481_s25, 4  ;;  %s1486_s30 = scalar_lea.hbm %s2256_s2, 8 }
  0x3a   : > { %521 = vmatpush.msra.mxu0 %v183_v8  ;;  %1334 = vmatpush.msra.mxu2 %v183_v8  ;;  %v218_v22 = vld [vmem:[#allocation5 + $0xe8] sm:$0xff]  ;;  %v1716_v24 = vld [vmem:[#allocation5 + $0x18] sm:$0xff]  ;;  %v217_v26 = vld [vmem:[#allocation5 + $0xe0] sm:$0xff]  ;;  %p1483_p1 = scmp.ne.s32.totalorder %s1481_s25, %s1482_s26  ;;  %p1487_p11 = scmp.lt.s32.totalorder %s1481_s25, %s2256_s2 }
  0x3b   : > { %652 = vmatpush.msra.mxu1 %v184_v9  ;;  %1337 = vmatpush.msra.mxu3 %v184_v9  ;;  %v1720_v27 = vld [vmem:[#allocation5 + $0x98] sm:$0xff]  ;;  %v1727_v28 = vld [vmem:[#allocation5 + $0x20] sm:$0xff]  ;;  %v1731_v29 = vld [vmem:[#allocation5 + $0xa8] sm:$0xff]  ;;  %p1488_p9 = scmp.lt.s32.totalorder %s1486_s30, %s1482_s26 }
  0x3c   : > { %1234 = vmatmul.msk.f32.vlgmr.msra.gmra.mxu0 %vm422_vm1, %v1674_v10  ;;  %1257 = vmatmul.msk.f32.vlgmr.msra.gmra.mxu2 %vm422_vm1, %v212_v11  ;;  %v1733_v30 = vld [vmem:[#allocation5 + $0x90] sm:$0xff]  ;;  %v194_v31 = vld [vmem:[#allocation5 + $0x28] sm:$0xff]  ;;  %v1742_v32 = vld [vmem:[#allocation5 + $0xa0] sm:$0xff]  ;;  %p1484_p4 = pnand %p1483_p1, %p1627_p7 }
  0x3d   : > { %1273 = vmatmul.msk.f32.vlgmr.msra.gmra.mxu1 %vm422_vm1, %v1674_v10  ;;  %1295 = vmatmul.msk.f32.vlgmr.msra.gmra.mxu3 %vm422_vm1, %v1676_v12  ;;  %v1744_v33 = vld [vmem:[#allocation5 + $0x68] sm:$0xff]  ;;  %v195_v34 = vld [vmem:[#allocation5 + $0x30] sm:$0xff]  ;;  %v1755_v36 = vld [vmem:[#allocation5 + $0x78] sm:$0xff]  ;;  %p1489_p2 = por %p1488_p9, %p1487_p11 }
  0x3e   : > { %419 = vperm.xlu1 %1404, %v1678_v13   ;;  %399 = vperm.xlu0 %1403, %v1682_v14   ;;  %v1752_v35 = vld [vmem:[#allocation5 + $0x88] sm:$0xff]  ;;  %v201_v37 = vld [vmem:[#allocation5 + $0x60] sm:$0xff]  ;;  %v196_v38 = vld [vmem:[#allocation5 + $0x38] sm:$0xff]  ;;  %p1485_p8 = pneg %p1484_p4 }
  0x3f   : > { %394 = vperm.xlu2 %1405, %v1684_v15   ;;  %v1762_v39 = vld [vmem:[#allocation5 + $0x80] sm:$0xff]  ;;  %v1765_v40 = vld [vmem:[#allocation5 + $0x70] sm:$0xff]  ;;  %v200_v42 = vld [vmem:[#allocation5 + $0x58] sm:$0xff] }
  0x40   : > { %v197_v41 = vld [vmem:[#allocation5 + $0x40] sm:$0xff]  ;;  %v198_v43 = vld [vmem:[#allocation5 + $0x48] sm:$0xff]  ;;  %v199_v44 = vld [vmem:[#allocation5 + $0x50] sm:$0xff]  ;;  %p1490_p10 = pnand %p1489_p2, %p1485_p8 }
  0x41   : > { %v1804_v46 = vld [vmem:[#allocation5 + $0x130] sm:$0xff]  ;;  %v1808_v48 = vld [vmem:[#allocation5 + $0x140] sm:$0xff]  ;;  %v1812_v49 = vld [vmem:[#allocation5 + $0x138] sm:$0xff] }
  0x42   : > { %2293 = vst [vmem:[#allocation11_spill] sm:$0xff] %v1804_v46  ;;  %v1821_v50 = vld [vmem:[#allocation5 + $0x148] sm:$0xff]  ;;  %v1826_v51 = vld [vmem:[#allocation5 + $0x150] sm:$0xff] }
  0x43   : > { %2294 = vst [vmem:[#allocation12_spill] sm:$0xff] %v1808_v48 }
  0x44   : > { %1235 = vmatmul.msk.f32.gmra.mxu0 %vm422_vm1, %v1694_v16  ;;  %1258 = vmatmul.msk.f32.gmra.mxu2 %vm422_vm1, %v213_v17  ;;  %2295 = vst [vmem:[#allocation13_spill] sm:$0xff] %v1812_v49 }
  0x45   : > { %1274 = vmatmul.msk.f32.gmra.mxu1 %vm422_vm1, %v1694_v16  ;;  %1296 = vmatmul.msk.f32.gmra.mxu3 %vm422_vm1, %v212_v11  ;;  %2296 = vst [vmem:[#allocation14_spill] sm:$0xff] %v1821_v50 }
  0x46   : > { %414 = vperm.xlu1 %1404, %v1696_v18   ;;  %404 = vperm.xlu0 %1403, %v1700_v19   ;;  %2297 = vst [vmem:[#allocation15_spill] sm:$0xff] %v1826_v51 }
  0x47   : > { %359 = vperm.xlu2 %1405, %v214_v20  }
  0x4c   : > { %1236 = vmatmul.msk.f32.gmra.mxu0 %vm422_vm1, %v1708_v21  ;;  %1259 = vmatmul.msk.f32.gmra.mxu2 %vm422_vm1, %v214_v20 }
  0x4d   : > { %1275 = vmatmul.msk.f32.gmra.mxu1 %vm422_vm1, %v1708_v21  ;;  %1297 = vmatmul.msk.f32.gmra.mxu3 %vm422_vm1, %v213_v17 }
  0x4e   : > { %379 = vperm.xlu1 %1404, %v218_v22   ;;  %369 = vperm.xlu0 %1403, %v216_v23  }
  0x4f   : > { %354 = vperm.xlu2 %1405, %v213_v17  }
  0x54   : > { %1237 = vmatmul.msk.f32.gmra.mxu0 %vm422_vm1, %v1716_v24  ;;  %1260 = vmatmul.msk.f32.gmra.mxu2 %vm422_vm1, %v215_v25 }
  0x55   : > { %1276 = vmatmul.msk.f32.gmra.mxu1 %vm422_vm1, %v1716_v24  ;;  %1298 = vmatmul.msk.f32.gmra.mxu3 %vm422_vm1, %v214_v20 }
  0x56   : > { %374 = vperm.xlu1 %1404, %v217_v26   ;;  %364 = vperm.xlu0 %1403, %v215_v25  }
  0x57   : > { %329 = vperm.xlu2 %1405, %v1720_v27  }
  0x5c   : > { %1238 = vmatmul.msk.f32.gmra.mxu0 %vm422_vm1, %v1727_v28  ;;  %1261 = vmatmul.msk.f32.gmra.mxu2 %vm422_vm1, %v216_v23 }
  0x5d   : > { %1277 = vmatmul.msk.f32.gmra.mxu1 %vm422_vm1, %v1727_v28  ;;  %1299 = vmatmul.msk.f32.gmra.mxu3 %vm422_vm1, %v215_v25 }
  0x5e   : > { %349 = vperm.xlu1 %1404, %v212_v11   ;;  %339 = vperm.xlu0 %1403, %v1731_v29  }
  0x5f   : > { %324 = vperm.xlu2 %1405, %v1733_v30  }
  0x64   : > { %1239 = vmatmul.msk.f32.gmra.mxu0 %vm422_vm1, %v194_v31  ;;  %1262 = vmatmul.msk.f32.gmra.mxu2 %vm422_vm1, %v217_v26 }
  0x65   : > { %1278 = vmatmul.msk.f32.gmra.mxu1 %vm422_vm1, %v194_v31  ;;  %1300 = vmatmul.msk.f32.gmra.mxu3 %vm422_vm1, %v216_v23 }
  0x66   : > { %344 = vperm.xlu1 %1404, %v1676_v12   ;;  %334 = vperm.xlu0 %1403, %v1742_v32  }
  0x67   : > { %299 = vperm.xlu2 %1405, %v1744_v33  }
  0x6c   : > { %1240 = vmatmul.msk.f32.gmra.mxu0 %vm422_vm1, %v195_v34  ;;  %1263 = vmatmul.msk.f32.gmra.mxu2 %vm422_vm1, %v218_v22 }
  0x6d   : > { %1279 = vmatmul.msk.f32.gmra.mxu1 %vm422_vm1, %v195_v34  ;;  %1301 = vmatmul.msk.f32.gmra.mxu3 %vm422_vm1, %v217_v26 }
  0x6e   : > { %319 = vperm.xlu1 %1404, %v1752_v35   ;;  %309 = vperm.xlu0 %1403, %v1755_v36  }
  0x6f   : > { %294 = vperm.xlu2 %1405, %v201_v37  }
  0x74   : > { %1241 = vmatmul.msk.f32.gmra.mxu0 %vm422_vm1, %v196_v38  ;;  %1264 = vmatmul.msk.f32.gmra.mxu2 %vm422_vm1, %v1669_v3 }
  0x75   : > { %1280 = vmatmul.msk.f32.gmra.mxu1 %vm422_vm1, %v196_v38  ;;  %1302 = vmatmul.msk.f32.gmra.mxu3 %vm422_vm1, %v218_v22 }
  0x76   : > { %314 = vperm.xlu1 %1404, %v1762_v39   ;;  %304 = vperm.xlu0 %1403, %v1765_v40  }
  0x77   : > { %269 = vperm.xlu2 %1405, %v196_v38  }
  0x7c   : > { %1242 = vmatmul.msk.f32.gmra.mxu0 %vm422_vm1, %v197_v41  ;;  %1265 = vmatmul.msk.f32.gmra.mxu2 %vm422_vm1, %v1667_v2 }
  0x7d   : > { %1281 = vmatmul.msk.f32.gmra.mxu1 %vm422_vm1, %v197_v41  ;;  %1303 = vmatmul.msk.f32.gmra.mxu3 %vm422_vm1, %v1669_v3 }
  0x7e   : > { %289 = vperm.xlu1 %1404, %v200_v42   ;;  %279 = vperm.xlu0 %1403, %v198_v43  }
  0x7f   : > { %264 = vperm.xlu2 %1405, %v195_v34  }
  0x84   : > { %1243 = vmatmul.msk.f32.gmra.mxu0 %vm422_vm1, %v198_v43  ;;  %1266 = vmatmul.msk.f32.gmra.mxu2 %vm422_vm1, %v1684_v15 }
  0x85   : > { %1282 = vmatmul.msk.f32.gmra.mxu1 %vm422_vm1, %v198_v43  ;;  %1304 = vmatmul.msk.f32.gmra.mxu3 %vm422_vm1, %v1667_v2 }
  0x86   : > { %284 = vperm.xlu1 %1404, %v199_v44   ;;  %274 = vperm.xlu0 %1403, %v197_v41  }
  0x87   : > { %239 = vperm.xlu2 %1405, %v1694_v16  }
  0x8c   : > { %1244 = vmatmul.msk.f32.gmra.mxu0 %vm422_vm1, %v199_v44  ;;  %1267 = vmatmul.msk.f32.gmra.mxu2 %vm422_vm1, %v1682_v14 }
  0x8d   : > { %1283 = vmatmul.msk.f32.gmra.mxu1 %vm422_vm1, %v199_v44  ;;  %1305 = vmatmul.msk.f32.gmra.mxu3 %vm422_vm1, %v1684_v15 }
  0x8e   : > { %259 = vperm.xlu1 %1404, %v194_v31   ;;  %249 = vperm.xlu0 %1403, %v1716_v24  }
  0x8f   : > { %234 = vperm.xlu2 %1405, %v1674_v10   ;;  %v1794_v45 = vpop.permute.xlu2 %384 }
  0x94   : > { %1245 = vmatmul.msk.f32.gmra.mxu0 %vm422_vm1, %v200_v42  ;;  %1268 = vmatmul.msk.f32.gmra.mxu2 %vm422_vm1, %v1700_v19 }
  0x95   : > { %1284 = vmatmul.msk.f32.gmra.mxu1 %vm422_vm1, %v200_v42  ;;  %1306 = vmatmul.msk.f32.gmra.mxu3 %vm422_vm1, %v1682_v14 }
  0x96   : > { %254 = vperm.xlu1 %1404, %v1727_v28   ;;  %244 = vperm.xlu0 %1403, %v1708_v21  }
  0x97   : > { %918 = vperm.xlu2 %1405, %v1804_v46  }
  0x99   : > { %v1806_v47 = vpop.permute.xlu2 %394 }
  0x9c   : > { %1246 = vmatmul.msk.f32.gmra.mxu0 %vm422_vm1, %v201_v37  ;;  %1269 = vmatmul.msk.f32.gmra.mxu2 %vm422_vm1, %v1665_v1 }
  0x9d   : > { %1285 = vmatmul.msk.f32.gmra.mxu1 %vm422_vm1, %v201_v37  ;;  %1307 = vmatmul.msk.f32.gmra.mxu3 %vm422_vm1, %v1700_v19 }
  0x9e   : > { %928 = vperm.xlu1 %1404, %v1808_v48   ;;  %923 = vperm.xlu0 %1403, %v1812_v49  }
  0x9f   : > { %933 = vperm.xlu2 %1405, %v1821_v50  }
  0xa1   : > { %v1828_v52 = vpop.permute.xlu2 %359 }
  0xa4   : > { %1247 = vmatmul.msk.f32.gmra.mxu0 %vm422_vm1, %v1744_v33  ;;  %1270 = vmatmul.msk.f32.gmra.mxu2 %vm422_vm1, %v1696_v18 }
  0xa5   : > { %1286 = vmatmul.msk.f32.gmra.mxu1 %vm422_vm1, %v1744_v33  ;;  %1308 = vmatmul.msk.f32.gmra.mxu3 %vm422_vm1, %v1665_v1 }
  0xa6   : > { %v1836_v53 = vpop.permute.xlu1 %409  ;;  %1019 = vperm.xlu0 %1403, %v1826_v51  }
  0xa7   : > { %v1838_v54 = vpop.permute.xlu0 %389 }
  0xa9   : > { %v355_v55 = vpop.permute.xlu2 %354 }
  0xac   : > { %1248 = vmatmul.msk.f32.gmra.mxu0 %vm422_vm1, %v1765_v40  ;;  %1271 = vmatmul.msk.f32.gmra.mxu2 %vm422_vm1, %v1678_v13 }
  0xad   : > { %1287 = vmatmul.msk.f32.gmra.mxu1 %vm422_vm1, %v1765_v40  ;;  %1309 = vmatmul.msk.f32.gmra.mxu3 %vm422_vm1, %v1696_v18 }
  0xb0   : > { %v1849_v56 = vpop.permute.xlu1 %419  ;;  %v1851_v57 = vpop.permute.xlu0 %399 }
  0xb1   : > { %v1861_v59 = vpop.permute.xlu2 %329 }
  0xb4   : > { %1249 = vmatmul.msk.f32.gmra.mxu0 %vm422_vm1, %v1755_v36 }
  0xb5   : > { %1288 = vmatmul.msk.f32.gmra.mxu1 %vm422_vm1, %v1755_v36  ;;  %1310 = vmatmul.msk.f32.gmra.mxu3 %vm422_vm1, %v1678_v13 }
  0xb8   : > { %v1859_v58 = vpop.permute.xlu1 %414  ;;  %v1863_v60 = vpop.permute.xlu0 %404 }
  0xb9   : > { %v1865_v61 = vpop.f32.mrf.mxu0  ;;  %v1879_v4 = vpop.permute.xlu2 %324 }
  0xba   : > { %v1867_v62 = vpop.f32.mrf.mxu1 }
  0xbc   : > { %1250 = vmatmul.msk.f32.gmra.mxu0 %vm422_vm1, %v1762_v39 }
  0xbd   : > { %1289 = vmatmul.msk.f32.gmra.mxu1 %vm422_vm1, %v1762_v39 }
  0xbf   : > { %v592_v63 = vpop.f32.mrf.mxu2 }
  0xc0   : > { %v1873_v0 = vpop.permute.xlu1 %379  ;;  %v720_v1 = vpop.f32.mrf.mxu3 }
  0xc1   : > { %v1875_v2 = vpop.permute.xlu0 %369  ;;  %v1877_v3 = vpop.f32.mrf.mxu0 }
  0xc2   : > { %v1881_v5 = vpop.f32.mrf.mxu1  ;;  %v1895_v13 = vpop.permute.xlu2 %299 }
  0xc4   : > { %1251 = vmatmul.msk.f32.gmra.mxu0 %vm422_vm1, %v1752_v35 }
  0xc5   : > { %1290 = vmatmul.msk.f32.gmra.mxu1 %vm422_vm1, %v1752_v35 }
  0xc7   : > { %v595_v6 = vpop.f32.mrf.mxu2 }
  0xc8   : > { %v1887_v7 = vpop.permute.xlu1 %374  ;;  %v723_v8 = vpop.f32.mrf.mxu3  ;;  %v1908_v24 = vadd.f32 %v595_v6, %v355_v55 }
  0xc9   : > { %v365_v9 = vpop.permute.xlu0 %364  ;;  %v1889_v10 = vpop.f32.mrf.mxu0 }
  0xca   : > { %v1891_v11 = vpop.f32.mrf.mxu1  ;;  %2298 = vst [vmem:[#allocation16_spill] sm:$0xff] %v1908_v24  ;;  %v2257_v34 = vmax.f32 %v1908_v24, 0.0 }
  0xcc   : > { %1252 = vmatmul.msk.f32.gmra.mxu0 %vm422_vm1, %v1733_v30 }
  0xcd   : > { %1291 = vmatmul.msk.f32.gmra.mxu1 %vm422_vm1, %v1733_v30  ;;  %v1914_v30 = vpop.permute.xlu2 %294 }
  0xcf   : > { %v598_v14 = vpop.f32.mrf.mxu2 }
  0xd0   : > { %v350_v15 = vpop.permute.xlu1 %349  ;;  %v599_v16 = vadd.f32 %v598_v14, %v1828_v52  ;;  %v726_v17 = vpop.f32.mrf.mxu3 }
  0xd1   : > { %v593_v18 = vadd.f32 %v592_v63, %v350_v15  ;;  %v1900_v19 = vpop.permute.xlu0 %339  ;;  %v1902_v20 = vpop.f32.mrf.mxu0  ;;  %v727_v25 = vadd.f32 %v726_v17, %v355_v55  ;;  %v724_v26 = vadd.f32 %v723_v8, %v350_v15 }
  0xd2   : > { %v818_v21 = vmax.f32 %v599_v16, 0.0  ;;  %v1904_v23 = vpop.f32.mrf.mxu1 }
  0xd3   : > { %v814_v22 = vmax.f32 %v593_v18, 0.0  ;;  %v817_v35 = vmax.f32 %v727_v25, 0.0  ;;  %v815_v40 = vmax.f32 %v724_v26, 0.0 }
  0xd4   : > { %1253 = vmatmul.msk.f32.gmra.mxu0 %vm422_vm1, %v1720_v27 }
  0xd5   : > { %1292 = vmatmul.msk.f32.gmra.mxu1 %vm422_vm1, %v1720_v27  ;;  %v1912_v28 = vmax.f32 %v814_v22, %v818_v21  ;;  %v270_v22 = vpop.permute.xlu2 %269 }
  0xd7   : > { %2299 = vst [vmem:[#allocation17_spill] sm:$0xff] %v1912_v28  ;;  %v601_v31 = vpop.f32.mrf.mxu2 }
  0xd8   : > { %v1916_v33 = vpop.permute.xlu1 %344  ;;  %v602_v36 = vadd.f32 %v601_v31, %v365_v9  ;;  %v729_v37 = vpop.f32.mrf.mxu3 }
  0xd9   : > { %2300 = vst [vmem:[#allocation18_spill] sm:$0xff] %v1916_v33  ;;  %v721_v38 = vadd.f32 %v720_v1, %v1916_v33  ;;  %v1920_v39 = vpop.permute.xlu0 %334  ;;  %v730_v27 = vadd.f32 %v729_v37, %v1828_v52  ;;  %v1923_v41 = vpop.f32.mrf.mxu0 }
  0xda   : > { %v820_v42 = vmax.f32 %v602_v36, 0.0  ;;  %v1925_v44 = vpop.f32.mrf.mxu1 }
  0xdb   : > { %v813_v43 = vmax.f32 %v721_v38, 0.0  ;;  %v819_v55 = vmax.f32 %v730_v27, 0.0 }
  0xdc   : > { %1254 = vmatmul.msk.f32.gmra.mxu0 %vm422_vm1, %v1742_v32  ;;  %v1931_v63 = vmax.f32 %v2257_v34, %v820_v42 }
  0xdd   : > { %1293 = vmatmul.msk.f32.gmra.mxu1 %vm422_vm1, %v1742_v32  ;;  %v1935_v1 = vmax.f32 %v813_v43, %v817_v35  ;;  %v1937_v52 = vmax.f32 %v815_v40, %v819_v55 }
  0xdf   : > { %2301 = vst [vmem:[#allocation19_spill] sm:$0xff] %v1935_v1  ;;  %v604_v6 = vpop.f32.mrf.mxu2 }
  0xe0   : > { %2302 = vst [vmem:[#allocation20_spill] sm:$0xff] %v1937_v52  ;;  %v1939_v8 = vpop.permute.xlu1 %319  ;;  %v605_v14 = vadd.f32 %v604_v6, %v1875_v2  ;;  %v732_v15 = vpop.f32.mrf.mxu3 }
  0xe1   : > { %2303 = vst [vmem:[#allocation21_spill] sm:$0xff] %v1939_v8  ;;  %v1942_v16 = vpop.permute.xlu0 %309  ;;  %v733_v17 = vadd.f32 %v732_v15, %v365_v9  ;;  %v1944_v18 = vpop.f32.mrf.mxu0 }
  0xe2   : > { %v822_v25 = vmax.f32 %v605_v14, 0.0  ;;  %v1946_v26 = vpop.f32.mrf.mxu1 }
  0xe3   : > { %v821_v32 = vmax.f32 %v733_v17, 0.0 }
  0xe4   : > { %1255 = vmatmul.msk.f32.gmra.mxu0 %vm422_vm1, %v1731_v29  ;;  %v1950_v31 = vmax.f32 %v818_v21, %v822_v25  ;;  %v265_v21 = vpop.permute.xlu2 %264 }
  0xe5   : > { %1294 = vmatmul.msk.f32.gmra.mxu1 %vm422_vm1, %v1731_v29  ;;  %v1954_v36 = vmax.f32 %v817_v35, %v821_v32 }
  0xe7   : > { %v607_v37 = vpop.f32.mrf.mxu2 }
  0xe8   : > { %v1956_v38 = vpop.permute.xlu1 %314  ;;  %v735_v9 = vpop.f32.mrf.mxu3  ;;  %v608_v34 = vadd.f32 %v607_v37, %v1887_v7 }
  0xe9   : > { %2304 = vst [vmem:[#allocation22_spill] sm:$0xff] %v1956_v38  ;;  %v1958_v40 = vpop.permute.xlu0 %304  ;;  %v736_v27 = vadd.f32 %v735_v9, %v1875_v2  ;;  %v541_v42 = vpop.f32.mrf.mxu0 }
  0xea   : > { %v672_v43 = vpop.f32.mrf.mxu1  ;;  %v1970_v50 = vadd.f32 %v541_v42, %v265_v21 }
  0xeb   : > { %v823_v6 = vmax.f32 %v736_v27, 0.0  ;;  %v824_v27 = vmax.f32 %v608_v34, 0.0  ;;  %v1975_v48 = vadd.f32 %v672_v43, %v265_v21 }
  0xec   : > { %1256 = vmatmul.msk.f32.gmra.mxu0 %vm422_vm1, %v1676_v12  ;;  %v240_v51 = vpop.permute.xlu2 %239  ;;  %v2272_v28 = vmax.f32 %v1970_v50, 0.0 }
  0xed   : > { %v1963_v14 = vmax.f32 %v819_v55, %v823_v6  ;;  %v527_v46 = vadd.f32 %v1877_v3, %v240_v51  ;;  %v658_v24 = vadd.f32 %v1881_v5, %v240_v51  ;;  %v2273_v51 = vmax.f32 %v1975_v48, 0.0 }
  0xef   : > { %v610_v29 = vpop.f32.mrf.mxu2  ;;  %v770_v21 = vmax.f32 %v527_v46, 0.0 }
  0xf0   : > { %v1965_v35 = vpop.permute.xlu1 %289  ;;  %v738_v15 = vpop.f32.mrf.mxu3  ;;  %v611_v34 = vadd.f32 %v610_v29, %v1873_v0 }
  0xf1   : > { %v280_v17 = vpop.permute.xlu0 %279  ;;  %v544_v25 = vpop.f32.mrf.mxu0  ;;  %v739_v42 = vadd.f32 %v738_v15, %v1887_v7 }
  0xf2   : > { %v675_v32 = vpop.f32.mrf.mxu1  ;;  %v545_v52 = vadd.f32 %v544_v25, %v270_v22 }
  0xf3   : > { %v676_v38 = vadd.f32 %v675_v32, %v270_v22  ;;  %v825_v15 = vmax.f32 %v739_v42, 0.0 }
  0xf4   : > { %v782_v22 = vmax.f32 %v545_v52, 0.0 }
  0xf7   : > { %v613_v2 = vpop.f32.mrf.mxu2 }
  0xf8   : > { %v1968_v9 = vpop.permute.xlu1 %284  ;;  %v1973_v12 = vadd.f32 %v613_v2, %v1794_v45  ;;  %v741_v55 = vpop.f32.mrf.mxu3 }
  0xf9   : > { %v275_v6 = vpop.permute.xlu0 %274  ;;  %v547_v49 = vpop.f32.mrf.mxu0 }
  0xfa   : > { %v2271_v37 = vmax.f32 %v1973_v12, 0.0  ;;  %v548_v1 = vadd.f32 %v547_v49, %v275_v6  ;;  %v678_v33 = vpop.f32.mrf.mxu1  ;;  %v771_v49 = vmax.f32 %v658_v24, 0.0 }
  0xfb   : > { %v679_v2 = vadd.f32 %v678_v33, %v275_v6  ;;  %v826_v33 = vmax.f32 %v611_v34, 0.0  ;;  %v742_v34 = vadd.f32 %v741_v55, %v1873_v0 }
  0xfc   : > { %v1985_v43 = vmax.f32 %v824_v27, %v2271_v37  ;;  %v784_v3 = vmax.f32 %v548_v1, 0.0  ;;  %v783_v27 = vmax.f32 %v676_v38, 0.0 }
  0xfd   : > { %v785_v5 = vmax.f32 %v679_v2, 0.0 }
  0xfe   : > { %v1990_v29 = vmax.f32 %v2272_v28, %v784_v3 }
  0xff   : > { %v1996_v25 = vmax.f32 %v2273_v51, %v785_v5  ;;  %v616_v1 = vpop.f32.mrf.mxu2 }
 0x100   : > { %2305 = vst [vmem:[#allocation23_spill] sm:$0xff] %v1990_v29  ;;  %v260_v32 = vpop.permute.xlu1 %259  ;;  %v1999_v46 = vadd.f32 %v616_v1, %v1838_v54  ;;  %v744_v24 = vpop.f32.mrf.mxu3 }
 0x101   : > { %v539_v6 = vadd.f32 %v1944_v18, %v260_v32  ;;  %v670_v2 = vadd.f32 %v1946_v26, %v260_v32  ;;  %v250_v3 = vpop.permute.xlu0 %249  ;;  %v2005_v52 = vadd.f32 %v744_v24, %v1794_v45  ;;  %v550_v7 = vpop.f32.mrf.mxu0 }
 0x102   : > { %v533_v42 = vadd.f32 %v1902_v20, %v250_v3  ;;  %v664_v5 = vadd.f32 %v1904_v23, %v250_v3  ;;  %v2280_v38 = vmax.f32 %v1999_v46, 0.0  ;;  %v551_v28 = vadd.f32 %v550_v7, %v280_v17  ;;  %v681_v51 = vpop.f32.mrf.mxu1  ;;  %v235_v18 = vpop.permute.xlu2 %234 }
 0x103   : > { %v778_v1 = vmax.f32 %v539_v6, 0.0  ;;  %v779_v37 = vmax.f32 %v670_v2, 0.0  ;;  %v2275_v26 = vmax.f32 %v2005_v52, 0.0  ;;  %v682_v0 = vadd.f32 %v681_v51, %v280_v17 }
 0x104   : > { %v774_v32 = vmax.f32 %v533_v42, 0.0  ;;  %v775_v8 = vmax.f32 %v664_v5, 0.0  ;;  %v2013_v45 = vmax.f32 %v826_v33, %v2280_v38  ;;  %v786_v20 = vmax.f32 %v551_v28, 0.0 }
 0x105   : > { %v2015_v55 = vmax.f32 %v779_v37, %v783_v27  ;;  %v2017_v23 = vmax.f32 %v778_v1, %v782_v22  ;;  %v2021_v24 = vmax.f32 %v825_v15, %v2275_v26  ;;  %v787_v7 = vmax.f32 %v682_v0, 0.0 }
 0x106   : > { %v2023_v6 = vmax.f32 %v771_v49, %v775_v8  ;;  %v2025_v2 = vmax.f32 %v770_v21, %v774_v32  ;;  %v524_v17 = vadd.f32 %v1865_v61, %v235_v18  ;;  %v655_v51 = vadd.f32 %v1867_v62, %v235_v18 }
 0x107   : > { %2306 = vst [vmem:[#allocation24_spill] sm:$0xff] %v2017_v23  ;;  %v2029_v33 = vmax.f32 %v782_v22, %v786_v20  ;;  %v2033_v37 = vmax.f32 %v783_v27, %v787_v7  ;;  %v2035_v3 = vpop.f32.mrf.mxu2  ;;  %v827_v27 = vmax.f32 %v742_v34, 0.0 }
 0x108   : > { %2307 = vst [vmem:[#allocation25_spill] sm:$0xff] %v2025_v2  ;;  %v255_v15 = vpop.permute.xlu1 %254  ;;  %v747_v62 = vpop.f32.mrf.mxu3  ;;  %v768_v0 = vmax.f32 %v524_v17, 0.0  ;;  %v769_v61 = vmax.f32 %v655_v51, 0.0 }
 0x109   : > { %v536_v49 = vadd.f32 %v1923_v41, %v255_v15  ;;  %v667_v22 = vadd.f32 %v1925_v44, %v255_v15  ;;  %v245_v42 = vpop.permute.xlu0 %244  ;;  %v2046_v5 = vadd.f32 %v747_v62, %v1838_v54  ;;  %v553_v32 = vpop.f32.mrf.mxu0  ;;  %v2308_v44 = vmax.f32 %v1975_v48, 0.0 }
 0x10a   : > { %v530_v1 = vadd.f32 %v1889_v10, %v245_v42  ;;  %v661_v18 = vadd.f32 %v1891_v11, %v245_v42  ;;  %v684_v21 = vpop.f32.mrf.mxu1  ;;  %v2310_v54 = vmax.f32 %v1970_v50, 0.0 }
 0x10b   : > { %v776_v20 = vmax.f32 %v536_v49, 0.0  ;;  %v777_v7 = vmax.f32 %v667_v22, 0.0  ;;  %v2277_v8 = vmax.f32 %v2046_v5, 0.0 }
 0x10c   : > { %v772_v41 = vmax.f32 %v530_v1, 0.0  ;;  %v773_v26 = vmax.f32 %v661_v18, 0.0  ;;  %v685_v1 = vadd.f32 %v684_v21, %v1968_v9 }
 0x10d   : > { %v2053_v34 = vmax.f32 %v777_v7, %v2308_v44  ;;  %v2057_v15 = vmax.f32 %v776_v20, %v2310_v54  ;;  %v2061_v10 = vmax.f32 %v827_v27, %v2277_v8 }
 0x10e   : > { %v2063_v11 = vmax.f32 %v769_v61, %v773_v26  ;;  %v2065_v17 = vmax.f32 %v768_v0, %v772_v41  ;;  %v554_v26 = vadd.f32 %v553_v32, %v1968_v9  ;;  %v789_v54 = vmax.f32 %v685_v1, 0.0 }
 0x10f   : > { %2309 = vst [vmem:[#allocation26_spill] sm:$0xff] %v2053_v34  ;;  %v622_v51 = vpop.f32.mrf.mxu2 }
 0x110   : > { %2311 = vst [vmem:[#allocation27_spill] sm:$0xff] %v2057_v15  ;;  %v2073_v49 = vpop.f32.mrf.mxu3  ;;  %v788_v41 = vmax.f32 %v554_v26, 0.0 }
 0x111   : > { %2312 = vst [vmem:[#allocation28_spill] sm:$0xff] %v2065_v17  ;;  %v556_v22 = vpop.f32.mrf.mxu0 }
 0x112   : > { %v687_v42 = vpop.f32.mrf.mxu1  ;;  %v557_v9 = vadd.f32 %v556_v22, %v1965_v35 }
 0x117   : > { %v625_v27 = vpop.f32.mrf.mxu2 }
 0x118   : > { %v753_v61 = vpop.f32.mrf.mxu3 }
 0x119   : > { %v559_v18 = vpop.f32.mrf.mxu0 }
 0x11a   : > { %v560_v0 = vadd.f32 %v559_v18, %v1914_v30  ;;  %v690_v20 = vpop.f32.mrf.mxu1 }
 0x11b   : > { %v2079_v7 = vadd.f32 %v690_v20, %v1914_v30  ;;  %v688_v30 = vadd.f32 %v687_v42, %v1965_v35 }
 0x11c   : > { %v792_v44 = vmax.f32 %v560_v0, 0.0 }
 0x11d   : > { %v2276_v50 = vmax.f32 %v2079_v7, 0.0 }
 0x11e   : > { %v2082_v48 = vmax.f32 %v788_v41, %v792_v44 }
 0x11f   : > { %v2086_v32 = vmax.f32 %v789_v54, %v2276_v50  ;;  %v628_v62 = vpop.f32.mrf.mxu2  ;;  %v790_v54 = vmax.f32 %v557_v9, 0.0  ;;  %v791_v50 = vmax.f32 %v688_v30, 0.0 }
 0x120   : > { %2313 = vst [vmem:[#allocation29_spill] sm:$0xff] %v2082_v48  ;;  %v756_v21 = vpop.f32.mrf.mxu3 }
 0x121   : > { %v562_v26 = vpop.f32.mrf.mxu0 }
 0x122   : > { %v2095_v0 = vadd.f32 %v562_v26, %v1895_v13  ;;  %v693_v20 = vpop.f32.mrf.mxu1 }
 0x123   : > { %v2098_v41 = vadd.f32 %v693_v20, %v1895_v13  ;;  %v629_v13 = vadd.f32 %v628_v62, %v1836_v53 }
 0x124   : > { %v2278_v22 = vmax.f32 %v2095_v0, 0.0 }
 0x125   : > { %v2279_v8 = vmax.f32 %v2098_v41, 0.0 }
 0x126   : > { %v2104_v35 = vmax.f32 %v790_v54, %v2278_v22  ;;  %v623_v54 = vadd.f32 %v622_v51, %v1851_v57 }
 0x127   : > { %v2108_v42 = vmax.f32 %v791_v50, %v2279_v8  ;;  %v631_v26 = vpop.f32.mrf.mxu2  ;;  %v620_v50 = vadd.f32 %v2035_v3, %v1806_v47  ;;  %v626_v8 = vadd.f32 %v625_v27, %v1863_v60  ;;  %v2314_v3 = vmax.f32 %v1999_v46, 0.0 }
 0x128   : > { %v759_v18 = vpop.f32.mrf.mxu3  ;;  %v632_v22 = vadd.f32 %v631_v26, %v1859_v58  ;;  %v834_v9 = vmax.f32 %v623_v54, 0.0 }
 0x129   : > { %v565_v20 = vpop.f32.mrf.mxu0  ;;  %v832_v51 = vmax.f32 %v620_v50, 0.0  ;;  %v836_v26 = vmax.f32 %v626_v8, 0.0  ;;  %v751_v50 = vadd.f32 %v2073_v49, %v1806_v47  ;;  %v757_v8 = vadd.f32 %v756_v21, %v1863_v60 }
 0x12a   : > { %v566_v30 = vadd.f32 %v565_v20, %v1958_v40  ;;  %v2115_v1 = vpop.f32.mrf.mxu1  ;;  %v840_v17 = vmax.f32 %v632_v22, 0.0  ;;  %v906_v27 = vmax.f32 %v2314_v3, %v834_v9  ;;  %v2315_v22 = vmax.f32 %v1973_v12, 0.0 }
 0x12b   : > { %v833_v12 = vmax.f32 %v751_v50, 0.0  ;;  %v2316_v47 = vmax.f32 %v1950_v31, %v2013_v45  ;;  %v2318_v21 = vmax.f32 %v1931_v63, %v1985_v43  ;;  %v2320_v31 = vmax.f32 %v1963_v14, %v2061_v10 }
 0x12c   : > { %v796_v28 = vmax.f32 %v566_v30, 0.0  ;;  %v838_v30 = vmax.f32 %v629_v13, 0.0  ;;  %v908_v34 = vmax.f32 %v836_v26, %v840_v17  ;;  %v760_v13 = vadd.f32 %v759_v18, %v1836_v53 }
 0x12d   : > { %v2317_v53 = vmax.f32 %v2046_v5, 0.0  ;;  %v2321_v45 = vmax.f32 %v1954_v36, %v2021_v24  ;;  %v2322_v24 = vld [vmem:[#allocation21_spill] sm:$0xff] }
 0x12e   : > { %v2123_v38 = vmax.f32 %v792_v44, %v796_v28  ;;  %v754_v28 = vadd.f32 %v753_v61, %v1851_v57  ;;  %v839_v9 = vmax.f32 %v760_v13, 0.0 }
 0x12f   : > { %v634_v15 = vpop.f32.mrf.mxu2 }
 0x130   : > { %v635_v20 = vadd.f32 %v634_v15, %v1849_v56  ;;  %v762_v23 = vpop.f32.mrf.mxu3  ;;  %v904_v15 = vmax.f32 %v2315_v22, %v832_v51  ;;  %v835_v17 = vmax.f32 %v754_v28, 0.0 }
 0x131   : > { %v2126_v2 = vpop.f32.mrf.mxu0  ;;  %v763_v44 = vadd.f32 %v762_v23, %v1859_v58  ;;  %v837_v23 = vmax.f32 %v757_v8, 0.0 }
 0x132   : > { %v842_v48 = vmax.f32 %v635_v20, 0.0  ;;  %v699_v29 = vpop.f32.mrf.mxu1  ;;  %v912_v46 = vmax.f32 %v904_v15, %v908_v34  ;;  %v907_v60 = vmax.f32 %v2317_v53, %v835_v17 }
 0x133   : > { %v700_v36 = vadd.f32 %v699_v29, %v1942_v16 }
 0x134   : > { %v910_v62 = vmax.f32 %v838_v30, %v842_v48  ;;  %v841_v48 = vmax.f32 %v763_v44, 0.0 }
 0x135   : > { %v799_v53 = vmax.f32 %v700_v36, 0.0 }
 0x136   : > { %v914_v54 = vmax.f32 %v906_v27, %v910_v62  ;;  %v909_v49 = vmax.f32 %v837_v23, %v841_v48 }
 0x138   : > { %v765_v20 = vpop.f32.mrf.mxu3  ;;  %949 = vmatpush.msrb.mxu2 %v914_v54 }
 0x139   : > { %v766_v57 = vadd.f32 %v765_v20, %v1849_v56  ;;  %v571_v61 = vpop.f32.mrf.mxu0  ;;  %v2319_v56 = vmax.f32 %v2005_v52, 0.0 }
 0x13a   : > { %v702_v58 = vpop.f32.mrf.mxu1  ;;  %950 = vmatpush.msrb.mxu2 %v912_v46  ;;  %v697_v46 = vadd.f32 %v2115_v1, %v1958_v40  ;;  %v2324_v1 = vld [vmem:[#allocation17_spill] sm:$0xff] }
 0x13b   : > { %v843_v51 = vmax.f32 %v766_v57, 0.0  ;;  %v905_v18 = vmax.f32 %v2319_v56, %v833_v12  ;;  %v2323_v57 = vld [vmem:[#allocation22_spill] sm:$0xff] }
 0x13c   : > { %951 = vmatpush.msrb.mxu2 %v2316_v47  ;;  %v703_v12 = vadd.f32 %v702_v58, %v2323_v57  ;;  %v797_v58 = vmax.f32 %v697_v46, 0.0 }
 0x13d   : > { %v911_v34 = vmax.f32 %v839_v9, %v843_v51  ;;  %v913_v3 = vmax.f32 %v905_v18, %v909_v49 }
 0x13e   : > { %952 = vmatpush.msrb.mxu2 %v2318_v21  ;;  %v801_v56 = vmax.f32 %v703_v12, 0.0  ;;  %v2339_v12 = vld [vmem:[#allocation11_spill] sm:$0xff] }
 0x13f   : > { %v915_v26 = vmax.f32 %v907_v60, %v911_v34 }
 0x141   : > { %978 = vmatpush.msrb.mxu3 %v915_v26  ;;  %v574_v30 = vpop.f32.mrf.mxu0 }
 0x142   : > { %v705_v27 = vpop.f32.mrf.mxu1  ;;  %v575_v34 = vadd.f32 %v574_v30, %v2322_v24 }
 0x143   : > { %979 = vmatpush.msrb.mxu3 %v913_v3  ;;  %v706_v8 = vadd.f32 %v705_v27, %v2322_v24  ;;  %v2325_v3 = vld [vmem:[#allocation20_spill] sm:$0xff]  ;;  %v572_v27 = vadd.f32 %v571_v61, %v2323_v57  ;;  %v2332_v24 = vmax.f32 %v2095_v0, 0.0  ;;  %v2335_v0 = vmax.f32 %v2023_v6, %v2015_v55  ;;  %v2347_v6 = vld [vmem:[#allocation27_spill] sm:$0xff] }
 0x144   : > { %v2336_v57 = vmax.f32 %v2029_v33, %v2104_v35  ;;  %v2346_v55 = vld [vmem:[#allocation28_spill] sm:$0xff]  ;;  %v2349_v33 = vld [vmem:[#allocation13_spill] sm:$0xff]  ;;  %v2351_v35 = vld [vmem:[#allocation14_spill] sm:$0xff] }
 0x145   : > { %980 = vmatpush.msrb.mxu3 %v2320_v31  ;;  %v803_v29 = vmax.f32 %v706_v8, 0.0 }
 0x147   : > { %981 = vmatpush.msrb.mxu3 %v2321_v45  ;;  %v2326_v45 = vld [vmem:[#allocation18_spill] sm:$0xff] }
 0x149   : > { %v577_v5 = vpop.f32.mrf.mxu0 }
 0x14a   : > { %v708_v63 = vpop.f32.mrf.mxu1  ;;  %v578_v40 = vadd.f32 %v577_v5, %v1879_v4 }
 0x14b   : > { %v709_v15 = vadd.f32 %v708_v63, %v1879_v4  ;;  %v2328_v4 = vld [vmem:[#allocation19_spill] sm:$0xff] }
 0x14d   : > { %v805_v23 = vmax.f32 %v709_v15, 0.0  ;;  %v800_v15 = vmax.f32 %v572_v27, 0.0 }
 0x14f   : > { %v873_v30 = vmax.f32 %v801_v56, %v805_v23 }
 0x151   : > { %v580_v43 = vpop.f32.mrf.mxu0 }
 0x152   : > { %v711_v62 = vpop.f32.mrf.mxu1  ;;  %v581_v22 = vadd.f32 %v580_v43, %v1861_v59 }
 0x153   : > { %v712_v54 = vadd.f32 %v711_v62, %v1861_v59  ;;  %v802_v62 = vmax.f32 %v575_v34, 0.0  ;;  %v924_v34 = vpop.permute.xlu0 %923 }
 0x154   : > { %v806_v17 = vmax.f32 %v581_v22, 0.0 }
 0x155   : > { %v807_v59 = vmax.f32 %v712_v54, 0.0 }
 0x156   : > { %v874_v54 = vmax.f32 %v802_v62, %v806_v17 }
 0x157   : > { %v875_v18 = vmax.f32 %v803_v29, %v807_v59 }
 0x159   : > { %v583_v52 = vpop.f32.mrf.mxu0 }
 0x15a   : > { %v714_v28 = vpop.f32.mrf.mxu1  ;;  %v584_v51 = vadd.f32 %v583_v52, %v1920_v39  ;;  %v804_v52 = vmax.f32 %v578_v40, 0.0 }
 0x15b   : > { %v715_v44 = vadd.f32 %v714_v28, %v1920_v39 }
 0x15c   : > { %v808_v31 = vmax.f32 %v584_v51, 0.0  ;;  %v2348_v51 = vmax.f32 %v2346_v55, %v2347_v6 }
 0x15d   : > { %v809_v13 = vmax.f32 %v715_v44, 0.0  ;;  %v2329_v44 = vmax.f32 %v2079_v7, 0.0  ;;  %v2333_v7 = vmax.f32 %v2033_v37, %v2108_v42  ;;  %v2337_v37 = vld [vmem:[#allocation26_spill] sm:$0xff] }
 0x15e   : > { %v2338_v42 = vmax.f32 %v2063_v11, %v2337_v37  ;;  %v2350_v11 = vld [vmem:[#allocation12_spill] sm:$0xff] }
 0x15f   : > { %v881_v60 = vmax.f32 %v805_v23, %v809_v13  ;;  %v869_v22 = vmax.f32 %v2329_v44, %v797_v58  ;;  %v872_v13 = vmax.f32 %v800_v15, %v804_v52  ;;  %v2341_v23 = vld [vmem:[#allocation29_spill] sm:$0xff] }
 0x161   : > { %v586_v14 = vpop.f32.mrf.mxu0  ;;  %v889_v5 = vmax.f32 %v881_v60, %v2328_v4  ;;  %v877_v36 = vmax.f32 %v869_v22, %v873_v30 }
 0x162   : > { %v587_v10 = vadd.f32 %v586_v14, %v1900_v19  ;;  %v717_v50 = vpop.f32.mrf.mxu1  ;;  %v880_v14 = vmax.f32 %v804_v52, %v808_v31 }
 0x163   : > { %v718_v20 = vadd.f32 %v717_v50, %v1900_v19  ;;  %v569_v19 = vadd.f32 %v2126_v2, %v1942_v16  ;;  %v2327_v16 = vmax.f32 %v2098_v41, 0.0 }
 0x164   : > { %v810_v48 = vmax.f32 %v587_v10, 0.0  ;;  %v2330_v10 = vld [vmem:[#allocation16_spill] sm:$0xff] }
 0x165   : > { %v811_v9 = vmax.f32 %v718_v20, 0.0  ;;  %v871_v2 = vmax.f32 %v2327_v16, %v799_v53  ;;  %v798_v43 = vmax.f32 %v569_v19, 0.0  ;;  %v2331_v50 = vmax.f32 %v2330_v10, 0.0  ;;  %v1020_v10 = vpop.permute.xlu0 %1019 }
 0x166   : > { %v882_v47 = vmax.f32 %v806_v17, %v810_v48  ;;  %v876_v17 = vmax.f32 %v2123_v38, %v872_v13  ;;  %v2334_v48 = vmax.f32 %v1996_v25, %v2086_v32  ;;  %v2340_v38 = vld [vmem:[#allocation23_spill] sm:$0xff]  ;;  %v2343_v32 = vld [vmem:[#allocation25_spill] sm:$0xff] }
 0x167   : > { %v883_v49 = vmax.f32 %v807_v59, %v811_v9  ;;  %v879_v61 = vmax.f32 %v871_v2, %v875_v18  ;;  %v870_v8 = vmax.f32 %v2332_v24, %v798_v43  ;;  %v2342_v25 = vmax.f32 %v2340_v38, %v2341_v23  ;;  %v2344_v59 = vld [vmem:[#allocation24_spill] sm:$0xff] }
 0x168   : > { %v890_v21 = vmax.f32 %v882_v47, %v2324_v1  ;;  %v2345_v9 = vmax.f32 %v2343_v32, %v2344_v59 }
 0x169   : > { %v589_v26 = vpop.f32.mrf.mxu0  ;;  %v891_v39 = vmax.f32 %v883_v49, %v2325_v3  ;;  %v878_v46 = vmax.f32 %v870_v8, %v874_v54  ;;  %v919_v49 = vpop.permute.xlu2 %918  ;;  %v2352_v54 = vld [vmem:[#allocation15_spill] sm:$0xff] }
 0x16a   : > { %v590_v63 = vadd.f32 %v589_v26, %v2326_v45  ;;  %953 = vmatpush.msrb.mxu2 %v890_v21  ;;  %v929_v21 = vpop.permute.xlu1 %928 }
 0x16b   : > { %982 = vmatpush.msrb.mxu3 %v891_v39 }
 0x16c   : > { %v812_v28 = vmax.f32 %v590_v63, 0.0 }
 0x16d   : > { %983 = vmatpush.msrb.mxu3 %v889_v5 }
 0x16e   : > { %v884_v41 = vmax.f32 %v812_v28, %v2331_v50 }
 0x16f   : > { %984 = vmatpush.msrb.mxu3 %v879_v61 }
 0x170   : > { %v888_v20 = vmax.f32 %v880_v14, %v884_v41 }
 0x171   : > { %985 = vmatpush.msrb.mxu3 %v877_v36  ;;  %v934_v18 = vpop.permute.xlu2 %933  ;;  %v1067_v36 = vrot.slane %v2352_v54, 4 }
 0x172   : > { %954 = vmatpush.msrb.mxu2 %v888_v20 }
 0x173   : > { %986 = vmatpush.msrb.mxu3 %v2333_v7 }
 0x174   : > { %955 = vmatpush.msrb.mxu2 %v878_v46  ;;  %v1068_v46 = vrot.slane %v1020_v10, 4 }
 0x175   : > { %987 = vmatpush.msrb.mxu3 %v2334_v48 }
 0x176   : > { %956 = vmatpush.msrb.mxu2 %v876_v17 }
 0x177   : > { %988 = vmatpush.msrb.mxu3 %v2335_v0 }
 0x178   : > { %957 = vmatpush.msrb.mxu2 %v2336_v57 }
 0x179   : > { %989 = vmatpush.msrb.mxu3 %v2338_v42 }
 0x17a   : > { %1315 = vmatmul.msk.f32.vlgmr.msrb.gmra.mxu3 %vm936_vm2, %v2339_v12  ;;  %958 = vmatpush.msrb.mxu2 %v2342_v25 }
 0x17c   : > { %959 = vmatpush.msrb.mxu2 %v2345_v9 }
 0x17e   : > { %960 = vmatpush.msrb.mxu2 %v2348_v51 }
 0x17f   : > { %1311 = vmatmul.msk.f32.vlgmr.msrb.gmra.mxu2 %vm936_vm2, %v2339_v12 }
 0x182   : > { %1316 = vmatmul.msk.f32.gmra.mxu3 %vm936_vm2, %v2349_v33 }
 0x187   : > { %1312 = vmatmul.msk.f32.gmra.mxu2 %vm936_vm2, %v2349_v33 }
 0x18a   : > { %1317 = vmatmul.msk.f32.gmra.mxu3 %vm936_vm2, %v2350_v11 }
 0x18f   : > { %1313 = vmatmul.msk.f32.gmra.mxu2 %vm936_vm2, %v2350_v11 }
 0x192   : > { %1318 = vmatmul.msk.f32.gmra.mxu3 %vm936_vm2, %v2351_v35 }
 0x197   : > { %1314 = vmatmul.msk.f32.gmra.mxu2 %vm936_vm2, %v2351_v35 }
 0x1fd   : > { %v991_v47 = vpop.f32.mrf.mxu3 }
 0x1fe   : > { %v992_v58 = vadd.f32 %v991_v47, %v919_v49 }
 0x200   : > { %v1004_v31 = vmax.f32 %v992_v58, 0.0 }
 0x202   : > { %v962_v53 = vpop.f32.mrf.mxu2 }
 0x203   : > { %v963_v16 = vadd.f32 %v962_v53, %v919_v49 }
 0x205   : > { %v994_v29 = vpop.f32.mrf.mxu3  ;;  %v1003_v28 = vmax.f32 %v963_v16, 0.0 }
 0x206   : > { %v995_v40 = vadd.f32 %v994_v29, %v924_v34 }
 0x208   : > { %v1006_v3 = vmax.f32 %v995_v40, 0.0 }
 0x20a   : > { %v965_v60 = vpop.f32.mrf.mxu2  ;;  %v1012_v30 = vmax.f32 %v1004_v31, %v1006_v3 }
 0x20b   : > { %v966_v27 = vadd.f32 %v965_v60, %v924_v34 }
 0x20d   : > { %v997_v19 = vpop.f32.mrf.mxu3  ;;  %v1005_v43 = vmax.f32 %v966_v27, 0.0 }
 0x20e   : > { %v998_v56 = vadd.f32 %v997_v19, %v929_v21 }
 0x20f   : > { %v1011_v61 = vmax.f32 %v1003_v28, %v1005_v43 }
 0x210   : > { %v1008_v45 = vmax.f32 %v998_v56, 0.0 }
 0x212   : > { %v968_v1 = vpop.f32.mrf.mxu2 }
 0x213   : > { %v969_v2 = vadd.f32 %v968_v1, %v929_v21 }
 0x215   : > { %v1000_v26 = vpop.f32.mrf.mxu3  ;;  %v1007_v44 = vmax.f32 %v969_v2, 0.0 }
 0x216   : > { %v1001_v39 = vadd.f32 %v1000_v26, %v934_v18 }
 0x218   : > { %v1010_v63 = vmax.f32 %v1001_v39, 0.0 }
 0x21a   : > { %v1014_v4 = vmax.f32 %v1008_v45, %v1010_v63  ;;  %v971_v5 = vpop.f32.mrf.mxu2 }
 0x21b   : > { %v972_v62 = vadd.f32 %v971_v5, %v934_v18 }
 0x21c   : > { %v1016_v52 = vmax.f32 %v1012_v30, %v1014_v4 }
 0x21d   : > { %v1009_v22 = vmax.f32 %v972_v62, 0.0 }
 0x21e   : > { %1060 = vmatpush.msra.mxu3 %v1016_v52 }
 0x21f   : > { %v1013_v15 = vmax.f32 %v1007_v44, %v1009_v22  ;;  %1320 = vmatmul.msk.f32.vlgmr.msra.gmra.mxu3 %vm1022_vm3, %v2352_v54 }
 0x221   : > { %v1015_v14 = vmax.f32 %v1011_v61, %v1013_v15 }
 0x223   : > { %1040 = vmatpush.msra.mxu2 %v1015_v14 }
 0x224   : > { %1319 = vmatmul.msk.f32.vlgmr.msra.gmra.mxu2 %vm1022_vm3, %v2352_v54 }
 0x2a2   : > { %v1062_v50 = vpop.f32.mrf.mxu3 }
 0x2a3   : > { %v1063_v41 = vadd.f32 %v1062_v50, %v1020_v10 }
 0x2a5   : > { %v1066_v24 = vmax.f32 %v1063_v41, 0.0 }
 0x2a7   : > { %1323 = vmatpush.msk.msrb.mxu3 %vm1073_vm4, %v1066_v24  ;;  %v1042_v8 = vpop.f32.mrf.mxu2 }
 0x2a8   : > { %v1043_v13 = vadd.f32 %v1042_v8, %v1020_v10  ;;  %1324 = vmatmul.msk.f32.vlgmr.msrb.gmra.mxu3 %vm1070_vm5, %v1067_v36 }
 0x2aa   : > { %v1065_v20 = vmax.f32 %v1043_v13, 0.0 }
 0x2ac   : > { %1321 = vmatpush.msk.msrb.mxu2 %vm1073_vm4, %v1065_v20 }
 0x2ad   : > { %1322 = vmatmul.msk.f32.vlgmr.msrb.gmra.mxu2 %vm1070_vm5, %v1067_v36 }
 0x32b   : > { %v1117_v7 = vpop.f32.mrf.mxu3 }
 0x32c   : > { %v1118_v17 = vadd.f32 %v1117_v7, %v1068_v46 }
 0x32e   : > { %v1122_v0 = vrot.slane %v1118_v17, 6 }
 0x330   : > { %v1097_v48 = vpop.f32.mrf.mxu2 }
 0x331   : > { %v1098_v57 = vadd.f32 %v1097_v48, %v1068_v46 }
 0x333   : > { %v1124_v37 = vsel %vm1123_vm6, %v1098_v57, %v1122_v0 }
 0x334   : > { %1126 = vst [vmem:[%s180_s19] sm:$0xf] %v1124_v37 }
 0x335   : > { %1493 = shalt.err (!%p1490_p10)
}
 0x336   : > { %1346 = dma.vmem_to_hbm [thread:$0]  (%p1627_p7), %s1142_s22, 64, %s1144_s24, %s1128_s13  }
 0x337 PF: > { %s1155_s6 = sand.u32 1, %s1524_s9   ;;  %p2353_p12 = scmp.ge.s32.totalorder %s1536_s12, 2 }
 0x338   : > { %s1156_s7 = scalar_lea.sflag [#allocation4], %s1155_s6 }
 0x339   : > { %p1357_p13 = pnand %p2353_p12, %p1595_p6 }
 0x33b   : > { %p1358_p0 = pneg %p1357_p13 }
 0x33d   : > { %1519 = dma.done.wait (%p1358_p0), %s1156_s7, 64  }
 0x33e   : > { %1521 = vsyncadd (%p1358_p0), %s1156_s7, 4294967232  ;;  %p16_p3 = scmp.ge.s32.totalorder %s1613_s23, 4   ;;  %s2354_s9 = smov %s1528_s10 }
 0x33f   : > { %s2355_s10 = smov %s1532_s11  ;;  %s2356_s11 = smov %s1623_s28 }
 0x340   : > { %s2357_s12 = smov %s1613_s23  ;;  %18 = sbr.rel (!%p16_p3) target bundleno = 6 (0x6), region = 77 }
 0x345   :  { %1162 = vsyncpa [#allocation3], 1 }
 0x346   :  { %1164 = vsyncpa [#allocation3 + $0x1], 1 }
 0x347   :  { %1165 = vsyncpa [#allocation6], 1 }
 0x348   :  { %1166 = vsyncpa [#allocation4], 1 }
 0x349   :  { %1168 = vsyncpa [#allocation4 + $0x1], 1 }

</bundles_post_ra>
